<compile_context>
chip_gen: v7x
topology: tpu7x:2x2x1
jax: 0.10.0
libtpu: 0.0.40
codegen_flags: <defaults>
</compile_context>

<pallas_src>
import jax
import jax.numpy as jnp
from jax import lax
from jax.experimental import pallas as pl
from jax.experimental.pallas import tpu as pltpu
import numpy as np


# ----------------------------------------------------------------------------
# helpers
# ----------------------------------------------------------------------------
def _round_up(x, m):
    return ((x + m - 1) // m) * m


def _vmem_budget_bytes():
    """~75% of physical VMEM: leaves Mosaic headroom (critical on v7x, 64 MiB)
    while lifting the small default scoped limit on v5e/v6e (128 MiB)."""
    try:
        cap = int(pltpu.get_tpu_info().vmem_capacity_bytes)
    except Exception:
        cap = 64 * 1024 * 1024
    return max(32 * 1024 * 1024, (cap * 3) // 4)


def _choose_tiles(ntok, hdim, v_pad, itemsize, budget):
    """Pick (tq, tv) so double-buffered tiles + temporaries fit the VMEM budget.
    Priority: biggest tq first (the W re-streaming / bandwidth lever), then tv."""
    def fits(tq, tv):
        hid = 2 * tq * hdim * itemsize        # hidden tiles (double-buffered)
        w = 2 * hdim * tv * itemsize          # lm_head tiles (double-buffered)
        tmp = 3 * tq * tv * 4                 # f32 logits / exp / select temporaries
        scr = 4 * max(tq, 8) * 128 * 4        # four (tq,1) f32 scratch, lane-padded
        out = 4 * max(tq, 8) * 128 * 4        # two small (tq,1) f32 outputs, buffered
        return hid + w + tmp + scr + out <= budget

    tv_opts = [t for t in (512, 256, 128) if v_pad % t == 0] or [128]
    one_shot = min(_round_up(max(ntok, 1), 16), 1024)
    tq_opts = [t for t in sorted({one_shot, 1024, 512, 256, 128, 64, 32, 16},
                                 reverse=True) if t <= one_shot]
    for tq in tq_opts:
        for tv in tv_opts:
            if fits(tq, tv):
                return tq, tv
    return 16, 128


# ----------------------------------------------------------------------------
# fused lm_head + log p(target) + entropy kernel
# ----------------------------------------------------------------------------
def _make_kernel(tv, v_real, v_pad, with_entropy):
    need_vmask = (v_pad != v_real)

    def kernel(h_ref, w_ref, tgt_ref, logp_ref, ent_ref, m_scr, l_scr, u_scr, t_scr):
        """Grid = (n_q, n_v), vocab tile index innermost ("arbitrary").

        h_ref   : (tq, H)  bf16 hidden-state tile for q-tile q
        w_ref   : (H, tv)  bf16 lm_head weight tile for vocab tile v
        tgt_ref : (tq, 1)  int32 next-token ids
        logp_ref: (tq, 1)  f32 log p(target)   -- written at v == last
        ent_ref : (tq, 1)  f32 entropy(logits) -- written at v == last
        scratch : m (running max), l (sum exp), u (sum exp*logit), t (target logit)
        """
        v_idx = pl.program_id(1)

        @pl.when(v_idx == 0)
        def _():
            m_scr[...] = jnp.full_like(m_scr, -jnp.inf)
            l_scr[...] = jnp.zeros_like(l_scr)
            u_scr[...] = jnp.zeros_like(u_scr)
            t_scr[...] = jnp.zeros_like(t_scr)

        # bf16 operands straight into the MXU, f32 accumulation.
        logits = jnp.dot(h_ref[...], w_ref[...],
                         preferred_element_type=jnp.float32)        # (tq, tv) f32

        # loop-invariant local iota; avoid the full-tile "+ v_idx*tv" add.
        local_ids = lax.broadcasted_iota(jnp.int32, logits.shape, 1)

        if need_vmask:
            # padded vocab columns -> huge negative, so exp() underflows to 0
            # (finite value, not -inf, to keep e*logits NaN-free).
            logits = jnp.where(local_ids < (v_real - v_idx * tv), logits, -1e30)

        # --- target-logit gather (one-hot select within this vocab tile) -----
        hit = local_ids == (tgt_ref[...] - v_idx * tv)              # (tq, tv)
        t_scr[...] += jnp.sum(jnp.where(hit, logits, 0.0), axis=-1, keepdims=True)

        # --- online logsumexp (and sum(exp * logits) for entropy) ------------
        m_prev = m_scr[...]
        m_new = jnp.maximum(m_prev, jnp.max(logits, axis=-1, keepdims=True))
        alpha = jnp.exp(m_prev - m_new)        # rescales previous partial sums
        e = jnp.exp(logits - m_new)            # single exp over the tile (EUP)
        l_scr[...] = alpha * l_scr[...] + jnp.sum(e, axis=-1, keepdims=True)
        if with_entropy:
            u_scr[...] = alpha * u_scr[...] + jnp.sum(e * logits, axis=-1,
                                                      keepdims=True)
        m_scr[...] = m_new

        @pl.when(v_idx == pl.num_programs(1) - 1)
        def _():
            l = l_scr[...]
            lse = m_scr[...] + jnp.log(l)
            # log p(target) = logit[target] - logsumexp(logits)
            logp_ref[...] = t_scr[...] - lse
            if with_entropy:
                # entropy = lse - sum(softmax * logits); exact divide, once per
                # q tile (negligible), tighter than the approx reciprocal.
                ent_ref[...] = lse - u_scr[...] / l
            else:
                ent_ref[...] = jnp.zeros_like(ent_ref)

    return kernel


def fused_logprob_entropy(hidden_tok, lm_head_w, targets_tok, with_entropy=True):
    """hidden_tok: (N, H); lm_head_w: (H, V); targets_tok: (N,) int
    -> (log p(target) (N,) f32, entropy (N,) f32)."""
    N, H = hidden_tok.shape
    V = lm_head_w.shape[1]
    itemsize = jnp.dtype(hidden_tok.dtype).itemsize

    budget = _vmem_budget_bytes()
    v_pad = _round_up(V, 128)
    tq, tv = _choose_tiles(N, H, v_pad, itemsize, budget)
    n_pad = _round_up(N, tq)
    n_q, n_v = n_pad // tq, v_pad // tv

    # explicit padding in the wrapper (no full-extent BlockSpec fallback):
    if n_pad != N:
        hidden_tok = jnp.pad(hidden_tok, ((0, n_pad - N), (0, 0)))
        targets_tok = jnp.pad(targets_tok, ((0, n_pad - N),))
    if v_pad != V:
        lm_head_w = jnp.pad(lm_head_w, ((0, 0), (0, v_pad - V)))
    tgt2 = targets_tok.astype(jnp.int32).reshape(n_pad, 1)

    w_itemsize = jnp.dtype(lm_head_w.dtype).itemsize
    cost = pl.CostEstimate(
        flops=2 * n_pad * H * v_pad,
        transcendentals=n_pad * v_pad,
        bytes_accessed=(n_pad * H * itemsize           # hidden read once
                        + n_q * H * v_pad * w_itemsize  # W streamed once per q tile
                        + n_pad * 4                     # targets
                        + 2 * n_pad * 4),               # outputs
    )

    kernel = _make_kernel(tv, V, v_pad, with_entropy)
    logp, ent = pl.pallas_call(
        kernel,
        out_shape=(jax.ShapeDtypeStruct((n_pad, 1), jnp.float32),
                   jax.ShapeDtypeStruct((n_pad, 1), jnp.float32)),
        grid_spec=pltpu.PrefetchScalarGridSpec(
            num_scalar_prefetch=0,
            grid=(n_q, n_v),
            in_specs=[
                pl.BlockSpec((tq, H), lambda q, v: (q, 0)),    # hidden tile
                pl.BlockSpec((H, tv), lambda q, v: (0, v)),    # lm_head tile
                pl.BlockSpec((tq, 1), lambda q, v: (q, 0)),    # targets tile
            ],
            out_specs=(
                pl.BlockSpec((tq, 1), lambda q, v: (q, 0)),
                pl.BlockSpec((tq, 1), lambda q, v: (q, 0)),
            ),
            scratch_shapes=[pltpu.VMEM((tq, 1), jnp.float32)] * 4,
        ),
        compiler_params=pltpu.CompilerParams(
            dimension_semantics=("parallel", "arbitrary"),
            vmem_limit_bytes=budget),
        cost_estimate=cost,
    )(hidden_tok, lm_head_w, tgt2)
    return logp[:N, 0], ent[:N, 0]


# ----------------------------------------------------------------------------
# synthetic backbone + Actor.forward
# ----------------------------------------------------------------------------
def init_params(key, vocab, hidden, max_seq, dtype=jnp.bfloat16):
    """Deterministic synthetic backbone + lm_head (bf16=True default in Actor)."""
    k1, k2, k3, k4 = jax.random.split(key, 4)
    s = 0.02
    return {
        "embed": (jax.random.normal(k1, (vocab, hidden), jnp.float32) * s).astype(dtype),
        "pos": (jax.random.normal(k2, (max_seq, hidden), jnp.float32) * s).astype(dtype),
        "w1": (jax.random.normal(k3, (hidden, hidden), jnp.float32) * s).astype(dtype),
        "b1": jnp.zeros((hidden,), jnp.float32),
        "lm_head": (jax.random.normal(k4, (hidden, vocab), jnp.float32) * s).astype(dtype),
    }


def _backbone(params, sequences, attention_mask):
    """Shared synthetic backbone (stands in for the pretrained HF causal LM)."""
    # position_ids = attention_mask.cumsum(-1) - 1 ; masked_fill_(mask==0, 1)
    position_ids = jnp.cumsum(attention_mask.astype(jnp.int32), axis=-1) - 1
    position_ids = jnp.where(attention_mask == 0, 1, position_ids)
    # TODO(synk): real Actor wraps an arbitrary pretrained HF causal LM; a
    # minimal deterministic embedding + dense/tanh backbone is used instead.
    emb = params["embed"][sequences] + params["pos"][position_ids]      # (B,T,H) bf16
    pre = jnp.dot(emb, params["w1"],
                  preferred_element_type=jnp.float32) + params["b1"]    # bf16 MXU, f32 acc
    return jnp.tanh(pre).astype(params["embed"].dtype)                  # (B,T,H) bf16


def actor_forward(params, sequences, num_actions, attention_mask, with_entropy=True):
    """Mirrors Actor.forward (packing_samples=False, return_output/with_entropy path)."""
    num_actions = int(num_actions)
    B, T = sequences.shape
    assert 0 < num_actions <= T - 1

    hidden = _backbone(params, sequences, attention_mask)               # (B,T,H)

    # Actor.forward only consumes the last num_actions positions:
    #   action_log_probs = log_probs_from_logits(logits[:, :-1], seq[:, 1:])[:, -num_actions:]
    #   action_entropy   = entropy_from_logits(logits[:, -num_actions-1:-1, :])
    # Both use logits at positions [T-1-num_actions, T-2]; feed ONLY those to
    # the fused kernel, flattened over (batch, action-token) so one q tile can
    # span batches.
    start = T - 1 - num_actions
    h_act = hidden[:, start:T - 1, :].reshape(B * num_actions, hidden.shape[-1])
    tgt_act = sequences[:, start + 1:T].reshape(B * num_actions)

    logp, ent = fused_logprob_entropy(h_act, params["lm_head"], tgt_act,
                                      with_entropy=with_entropy)
    action_log_probs = logp.reshape(B, num_actions)
    action_entropy = ent.reshape(B, num_actions) if with_entropy else None
    return action_log_probs, action_entropy


def _reference(params, sequences, num_actions, attention_mask):
    """Pure-JAX reference for correctness checking (f32 lm_head path)."""
    hidden = _backbone(params, sequences, attention_mask)
    logits = (hidden.astype(jnp.float32) @ params["lm_head"].astype(jnp.float32))
    lp = jax.nn.log_softmax(logits[:, :-1, :], axis=-1)
    log_probs = jnp.take_along_axis(lp, sequences[:, 1:, None], axis=-1)[..., 0]
    act_logits = logits[:, -num_actions - 1:-1, :]
    pd = jax.nn.softmax(act_logits, axis=-1)
    ent = jax.nn.logsumexp(act_logits, axis=-1) - jnp.sum(pd * act_logits, axis=-1)
    return log_probs[:, -num_actions:], ent


if __name__ == "__main__":
    B, T, H, V = 2, 8, 32, 128
    num_actions = 4

    key = jax.random.PRNGKey(0)
    kp, ks = jax.random.split(key)
    params = init_params(kp, vocab=V, hidden=H, max_seq=T)
    sequences = jax.random.randint(ks, (B, T), 0, V, dtype=jnp.int32)
    attention_mask = jnp.ones((B, T), dtype=jnp.int32)

    action_log_probs, action_entropy = actor_forward(
        params, sequences, num_actions, attention_mask, with_entropy=True)
    jax.block_until_ready((action_log_probs, action_entropy))

    ref_lp, ref_ent = _reference(params, sequences, num_actions, attention_mask)
    # bf16 MXU operands (f32 accumulation) vs f32 reference matmul: compare with
    # a slightly loosened tolerance (documented for downstream ratio/KL use).
    np.testing.assert_allclose(np.asarray(action_log_probs), np.asarray(ref_lp),
                               rtol=1e-3, atol=1e-3)
    np.testing.assert_allclose(np.asarray(action_entropy), np.asarray(ref_ent),
                               rtol=1e-3, atol=1e-3)

    print("KERNEL_OK")
</pallas_src>

<mosaic_0001>
module attributes {stable_mosaic.version = 11 : i64} {
  func.func @kernel(%arg0: i32, %arg1: i32, %arg2: memref<16x32xbf16, #tpu.memory_space<vmem>>, %arg3: memref<32x128xbf16, #tpu.memory_space<vmem>>, %arg4: memref<16x1xi32, #tpu.memory_space<vmem>>, %arg5: memref<16x1xf32, #tpu.memory_space<vmem>>, %arg6: memref<16x1xf32, #tpu.memory_space<vmem>>, %arg7: memref<16x1xf32, #tpu.memory_space<vmem>>, %arg8: memref<16x1xf32, #tpu.memory_space<vmem>>, %arg9: memref<16x1xf32, #tpu.memory_space<vmem>>, %arg10: memref<16x1xf32, #tpu.memory_space<vmem>>) attributes {dimension_semantics = [#tpu.dimension_semantics<parallel>, #tpu.dimension_semantics<arbitrary>], iteration_bounds = array<i64: 1, 1>, scalar_prefetch = 0 : i64, scratch_operands = 4 : i64, tpu.core_type = #tpu.core_type<tc>, window_params = [{transform_indices = @transform_0, window_bounds = array<i64: 16, 32>}, {transform_indices = @transform_1, window_bounds = array<i64: 32, 128>}, {transform_indices = @transform_2, window_bounds = array<i64: 16, 1>}, {transform_indices = @transform_3, window_bounds = array<i64: 16, 1>}, {transform_indices = @transform_4, window_bounds = array<i64: 16, 1>}]} {
    %c0_i32 = arith.constant 0 : i32
    %0 = arith.cmpi eq, %arg1, %c0_i32 : i32
    %1 = arith.extui %0 : i1 to i32
    %c0_i32_0 = arith.constant 0 : i32
    %2 = arith.cmpi ne, %1, %c0_i32_0 : i32
    scf.if %2 {
      %cst_29 = arith.constant 0xFF800000 : f32
      %46 = vector.broadcast %cst_29 : f32 to vector<16x1xf32>
      %c0_30 = arith.constant 0 : index
      %c0_31 = arith.constant 0 : index
      %47 = vector.load %arg7[%c0_30, %c0_31] : memref<16x1xf32, #tpu.memory_space<vmem>>, vector<16x1xf32>
      tpu.vector_store %arg7[%c0_30, %c0_31], %46 {strides = array<i32>} : memref<16x1xf32, #tpu.memory_space<vmem>>, vector<16x1xf32>,
      %cst_32 = arith.constant 0.000000e+00 : f32
      %48 = vector.broadcast %cst_32 : f32 to vector<16x1xf32>
      %c0_33 = arith.constant 0 : index
      %c0_34 = arith.constant 0 : index
      %49 = vector.load %arg8[%c0_33, %c0_34] : memref<16x1xf32, #tpu.memory_space<vmem>>, vector<16x1xf32>
      tpu.vector_store %arg8[%c0_33, %c0_34], %48 {strides = array<i32>} : memref<16x1xf32, #tpu.memory_space<vmem>>, vector<16x1xf32>,
      %cst_35 = arith.constant 0.000000e+00 : f32
      %50 = vector.broadcast %cst_35 : f32 to vector<16x1xf32>
      %c0_36 = arith.constant 0 : index
      %c0_37 = arith.constant 0 : index
      %51 = vector.load %arg9[%c0_36, %c0_37] : memref<16x1xf32, #tpu.memory_space<vmem>>, vector<16x1xf32>
      tpu.vector_store %arg9[%c0_36, %c0_37], %50 {strides = array<i32>} : memref<16x1xf32, #tpu.memory_space<vmem>>, vector<16x1xf32>,
      %cst_38 = arith.constant 0.000000e+00 : f32
      %52 = vector.broadcast %cst_38 : f32 to vector<16x1xf32>
      %c0_39 = arith.constant 0 : index
      %c0_40 = arith.constant 0 : index
      %53 = vector.load %arg10[%c0_39, %c0_40] : memref<16x1xf32, #tpu.memory_space<vmem>>, vector<16x1xf32>
      tpu.vector_store %arg10[%c0_39, %c0_40], %52 {strides = array<i32>} : memref<16x1xf32, #tpu.memory_space<vmem>>, vector<16x1xf32>,
    } else {
    }
    %c0 = arith.constant 0 : index
    %c0_1 = arith.constant 0 : index
    %3 = vector.load %arg2[%c0, %c0_1] : memref<16x32xbf16, #tpu.memory_space<vmem>>, vector<16x32xbf16>
    %c0_2 = arith.constant 0 : index
    %c0_3 = arith.constant 0 : index
    %4 = vector.load %arg3[%c0_2, %c0_3] : memref<32x128xbf16, #tpu.memory_space<vmem>>, vector<32x128xbf16>
    %cst = arith.constant dense<0.000000e+00> : vector<16x128xf32>
    %5 = tpu.matmul %3, %4, %cst {dimension_numbers = #tpu.dot_dimension_numbers<[1], [0], [0], [1], [0, 0, 1, 1], [], []>} : vector<16x32xbf16>, vector<32x128xbf16>, vector<16x128xf32> -> vector<16x128xf32>
    %6 = tpu.iota {dimensions = array<i32: 1>} : vector<16x128xi32>
    %c0_4 = arith.constant 0 : index
    %c0_5 = arith.constant 0 : index
    %7 = vector.load %arg4[%c0_4, %c0_5] : memref<16x1xi32, #tpu.memory_space<vmem>>, vector<16x1xi32>
    %c128_i32 = arith.constant 128 : i32
    %8 = arith.muli %arg1, %c128_i32 : i32
    %9 = vector.broadcast %8 : i32 to vector<16x1xi32>
    %10 = arith.subi %7, %9 : vector<16x1xi32>
    %11 = vector.broadcast %10 : vector<16x1xi32> to vector<16x128xi32>
    %12 = arith.cmpi eq, %6, %11 : vector<16x128xi32>
    %c0_6 = arith.constant 0 : index
    %c0_7 = arith.constant 0 : index
    %13 = vector.load %arg10[%c0_6, %c0_7] : memref<16x1xf32, #tpu.memory_space<vmem>>, vector<16x1xf32>
    %cst_8 = arith.constant 0.000000e+00 : f32
    %14 = vector.broadcast %cst_8 : f32 to vector<16x128xf32>
    %15 = arith.select %12, %5, %14 : vector<16x128xi1>, vector<16x128xf32>
    %cst_9 = arith.constant dense<0.000000e+00> : vector<16xf32>
    %16 = vector.multi_reduction <add>, %15, %cst_9 [1] : vector<16x128xf32> to vector<16xf32>
    %17 = vector.shape_cast %16 : vector<16xf32> to vector<16x1xf32>
    %18 = arith.addf %13, %17 : vector<16x1xf32>
    %c0_10 = arith.constant 0 : index
    %c0_11 = arith.constant 0 : index
    %19 = vector.load %arg10[%c0_10, %c0_11] : memref<16x1xf32, #tpu.memory_space<vmem>>, vector<16x1xf32>
    tpu.vector_store %arg10[%c0_10, %c0_11], %18 {strides = array<i32>} : memref<16x1xf32, #tpu.memory_space<vmem>>, vector<16x1xf32>,
    %c0_12 = arith.constant 0 : index
    %c0_13 = arith.constant 0 : index
    %20 = vector.load %arg7[%c0_12, %c0_13] : memref<16x1xf32, #tpu.memory_space<vmem>>, vector<16x1xf32>
    %cst_14 = arith.constant dense<0xFF800000> : vector<16xf32>
    %21 = vector.multi_reduction <maximumf>, %5, %cst_14 [1] : vector<16x128xf32> to vector<16xf32>
    %22 = vector.shape_cast %21 : vector<16xf32> to vector<16x1xf32>
    %23 = arith.maximumf %20, %22 : vector<16x1xf32>
    %24 = arith.subf %20, %23 : vector<16x1xf32>
    %25 = math.exp %24 : vector<16x1xf32>
    %26 = vector.broadcast %23 : vector<16x1xf32> to vector<16x128xf32>
    %27 = arith.subf %5, %26 : vector<16x128xf32>
    %28 = math.exp %27 : vector<16x128xf32>
    %c0_15 = arith.constant 0 : index
    %c0_16 = arith.constant 0 : index
    %29 = vector.load %arg8[%c0_15, %c0_16] : memref<16x1xf32, #tpu.memory_space<vmem>>, vector<16x1xf32>
    %30 = arith.mulf %25, %29 : vector<16x1xf32>
    %cst_17 = arith.constant dense<0.000000e+00> : vector<16xf32>
    %31 = vector.multi_reduction <add>, %28, %cst_17 [1] : vector<16x128xf32> to vector<16xf32>
    %32 = vector.shape_cast %31 : vector<16xf32> to vector<16x1xf32>
    %33 = arith.addf %30, %32 : vector<16x1xf32>
    %c0_18 = arith.constant 0 : index
    %c0_19 = arith.constant 0 : index
    %34 = vector.load %arg8[%c0_18, %c0_19] : memref<16x1xf32, #tpu.memory_space<vmem>>, vector<16x1xf32>
    tpu.vector_store %arg8[%c0_18, %c0_19], %33 {strides = array<i32>} : memref<16x1xf32, #tpu.memory_space<vmem>>, vector<16x1xf32>,
    %c0_20 = arith.constant 0 : index
    %c0_21 = arith.constant 0 : index
    %35 = vector.load %arg9[%c0_20, %c0_21] : memref<16x1xf32, #tpu.memory_space<vmem>>, vector<16x1xf32>
    %36 = arith.mulf %25, %35 : vector<16x1xf32>
    %37 = arith.mulf %28, %5 : vector<16x128xf32>
    %cst_22 = arith.constant dense<0.000000e+00> : vector<16xf32>
    %38 = vector.multi_reduction <add>, %37, %cst_22 [1] : vector<16x128xf32> to vector<16xf32>
    %39 = vector.shape_cast %38 : vector<16xf32> to vector<16x1xf32>
    %40 = arith.addf %36, %39 : vector<16x1xf32>
    %c0_23 = arith.constant 0 : index
    %c0_24 = arith.constant 0 : index
    %41 = vector.load %arg9[%c0_23, %c0_24] : memref<16x1xf32, #tpu.memory_space<vmem>>, vector<16x1xf32>
    tpu.vector_store %arg9[%c0_23, %c0_24], %40 {strides = array<i32>} : memref<16x1xf32, #tpu.memory_space<vmem>>, vector<16x1xf32>,
    %c0_25 = arith.constant 0 : index
    %c0_26 = arith.constant 0 : index
    %42 = vector.load %arg7[%c0_25, %c0_26] : memref<16x1xf32, #tpu.memory_space<vmem>>, vector<16x1xf32>
    tpu.vector_store %arg7[%c0_25, %c0_26], %23 {strides = array<i32>} : memref<16x1xf32, #tpu.memory_space<vmem>>, vector<16x1xf32>,
    %c0_i32_27 = arith.constant 0 : i32
    %43 = arith.cmpi eq, %arg1, %c0_i32_27 : i32
    %44 = arith.extui %43 : i1 to i32
    %c0_i32_28 = arith.constant 0 : i32
    %45 = arith.cmpi ne, %44, %c0_i32_28 : i32
    scf.if %45 {
      %c0_29 = arith.constant 0 : index
      %c0_30 = arith.constant 0 : index
      %46 = vector.load %arg8[%c0_29, %c0_30] : memref<16x1xf32, #tpu.memory_space<vmem>>, vector<16x1xf32>
      %c0_31 = arith.constant 0 : index
      %c0_32 = arith.constant 0 : index
      %47 = vector.load %arg7[%c0_31, %c0_32] : memref<16x1xf32, #tpu.memory_space<vmem>>, vector<16x1xf32>
      %48 = math.log %46 : vector<16x1xf32>
      %49 = arith.addf %47, %48 : vector<16x1xf32>
      %c0_33 = arith.constant 0 : index
      %c0_34 = arith.constant 0 : index
      %50 = vector.load %arg10[%c0_33, %c0_34] : memref<16x1xf32, #tpu.memory_space<vmem>>, vector<16x1xf32>
      %51 = arith.subf %50, %49 : vector<16x1xf32>
      %c0_35 = arith.constant 0 : index
      %c0_36 = arith.constant 0 : index
      %52 = vector.load %arg5[%c0_35, %c0_36] : memref<16x1xf32, #tpu.memory_space<vmem>>, vector<16x1xf32>
      tpu.vector_store %arg5[%c0_35, %c0_36], %51 {strides = array<i32>} : memref<16x1xf32, #tpu.memory_space<vmem>>, vector<16x1xf32>,
      %c0_37 = arith.constant 0 : index
      %c0_38 = arith.constant 0 : index
      %53 = vector.load %arg9[%c0_37, %c0_38] : memref<16x1xf32, #tpu.memory_space<vmem>>, vector<16x1xf32>
      %54 = arith.divf %53, %46 : vector<16x1xf32>
      %55 = arith.subf %49, %54 : vector<16x1xf32>
      %c0_39 = arith.constant 0 : index
      %c0_40 = arith.constant 0 : index
      %56 = vector.load %arg6[%c0_39, %c0_40] : memref<16x1xf32, #tpu.memory_space<vmem>>, vector<16x1xf32>
      tpu.vector_store %arg6[%c0_39, %c0_40], %55 {strides = array<i32>} : memref<16x1xf32, #tpu.memory_space<vmem>>, vector<16x1xf32>,
    } else {
    }
    return
  }
  func.func @transform_0(%arg0: i32, %arg1: i32) -> (i32, i32) {
    %c0_i32 = arith.constant 0 : i32
    %c0_i32_0 = arith.constant 0 : i32
    return %arg0, %c0_i32 : i32, i32
  }
  func.func @transform_1(%arg0: i32, %arg1: i32) -> (i32, i32) {
    %c0_i32 = arith.constant 0 : i32
    %c0_i32_0 = arith.constant 0 : i32
    return %c0_i32, %arg1 : i32, i32
  }
  func.func @transform_2(%arg0: i32, %arg1: i32) -> (i32, i32) {
    %c0_i32 = arith.constant 0 : i32
    %c0_i32_0 = arith.constant 0 : i32
    return %arg0, %c0_i32 : i32, i32
  }
  func.func @transform_3(%arg0: i32, %arg1: i32) -> (i32, i32) {
    %c0_i32 = arith.constant 0 : i32
    %c0_i32_0 = arith.constant 0 : i32
    return %arg0, %c0_i32 : i32, i32
  }
  func.func @transform_4(%arg0: i32, %arg1: i32) -> (i32, i32) {
    %c0_i32 = arith.constant 0 : i32
    %c0_i32_0 = arith.constant 0 : i32
    return %arg0, %c0_i32 : i32, i32
  }
}

</mosaic_0001>

<bundles_post_ra>
// kernel: tpu_custom_call.1
= control target key start
LH: loop header
LB: loop body
LE: loop exit
PB: predicated region body
PF: predicated region fallthrough
CT: control target
= control target key end

     0   :  { %10 = vsyncpa [#allocation7], 0  ;;  %s304_s15 = smov [#allocation6]   ;;  %s392_s0 = inlined_call_operand.hbm [shape: bf16[16,32], index: 0, kind: input, shape index: {}]   ;;  %s393_s1 = inlined_call_operand.vmem [shape: bf16[32,128], index: 1, kind: input, shape index: {}]   ;;  %s394_s2 = inlined_call_operand.vmem [shape: s32[16,1], index: 2, kind: input, shape index: {}]   ;;  %s395_s3 = inlined_call_operand.vmem [shape: f32[16,1], index: 3, kind: output, shape index: {0}]   ;;  %s396_s4 = inlined_call_operand.vmem [shape: f32[16,1], index: 4, kind: output, shape index: {1}]  }
   0x1   :  { %s16_s16 = sshll.u32 %s304_s15, 4  ;;  %s280_s19 = scalar_lea.hbm %s392_s0, 128  ;;  %s17_s16 = int_to_ptr.vmem [resolvable:$true] %s16_s16 }
   0x2   :  { %p281_p0 = scmp.ne.s32.totalorder %s392_s0, %s280_s19  ;;  %p284_p1 = scmp.lt.u32.totalorder %s280_s19, %s392_s0 }
   0x4   :  { %p286_p2 = pnand %p284_p1, %p281_p0 }
   0x6   :  { %289 = shalt.err (!%p286_p2)
}
   0x7   :  { %s290_s24 = scalar_lea.vmem %s17_s16, 128  ;;  %p295_p4 = scmp.lt.s32.totalorder %s17_s16, %s17_s16 }
   0x8   :  { %p291_p3 = scmp.ne.s32.totalorder %s17_s16, %s290_s24  ;;  %p296_p5 = scmp.lt.s32.totalorder %s290_s24, %s290_s24 }
   0xa   :  { %p297_p6 = por %p296_p5, %p295_p4 }
   0xc   :  { %p298_p7 = pnand %p297_p6, %p291_p3 }
   0xe   :  { %301 = shalt.err (!%p298_p7)
}
   0xf   :  { %s305_s25 = smov 64   ;;  %s306_s26 = smov 4  }
  0x10   :  { %22 = dma.hbm_to_vmem [thread:$0]  %s392_s0, 128, %s17_s16, [#allocation7], %s305_s25, %s305_s25, %s306_s26  }
  0x11   :  { %302 = dma.done.wait [#allocation7], 128  }
  0x12   :  { %303 = vsyncadd [#allocation7], 4294967168  ;;  %v307_v0 = vmov 0.0   ;;  %vm308_vm0 = vmmov 0   ;;  %v261_v1 = vld [vmem:[%s393_s1] sm:$0xff]   ;;  %v262_v2 = vld [vmem:[%s393_s1 + $0x8] sm:$0xff]   ;;  %v112_v26 = vlaneseq }
  0x13   :  { %244 = vmatprep.subr.bf16.mxu0 %v307_v0  ;;  %248 = vmatprep.mubr.msk.bf16.mxu0 %vm308_vm0, %v307_v0  ;;  %v263_v3 = vld [vmem:[#allocation6] sm:$0xff]   ;;  %vm67_vm1 = vcmask 261120   ;;  %v309_v4 = vmov 0   ;;  %vm35_vm2 = vcmask 7168   ;;  %v310_v5 = vmov -inf   ;;  %v115_v19 = vld [vmem:[%s394_s2 + $0x8] sm:$0xff] }
  0x14   :  { %245 = vmatpush3.bf16.msra.mxu0 %v261_v1  ;;  %260 = vset.pattern.permute.xlu0 %v309_v4  ;;  %36 = vst.msk [vmem:[#allocation2] sm:$0xff] %vm35_vm2, %v310_v5  ;;  %37 = vst.msk [vmem:[#allocation2 + $0x8] sm:$0xff] %vm35_vm2, %v310_v5  ;;  %v114_v10 = vld [vmem:[%s394_s2] sm:$0xff]  ;;  %v113_v28 = vand.u32 127, %v112_v26 }
  0x15   :  { %246 = vmatprep.subr.bf16.mxu0 %v307_v0  ;;  %259 = vset.pattern.permute.xlu1 %v309_v4  ;;  %38 = vst.msk [vmem:[#allocation3] sm:$0xff] %vm35_vm2, %v307_v0  ;;  %39 = vst.msk [vmem:[#allocation3 + $0x8] sm:$0xff] %vm35_vm2, %v307_v0 }
  0x16   :  { %40 = vst.msk [vmem:[#allocation4] sm:$0xff] %vm35_vm2, %v307_v0  ;;  %41 = vst.msk [vmem:[#allocation4 + $0x8] sm:$0xff] %vm35_vm2, %v307_v0 }
  0x17   :  { %42 = vst.msk [vmem:[#allocation5] sm:$0xff] %vm35_vm2, %v307_v0  ;;  %43 = vst.msk [vmem:[#allocation5 + $0x8] sm:$0xff] %vm35_vm2, %v307_v0 }
  0x18   :  { %247 = vmatpush3.bf16.msra.mxu0 %v262_v2 }
  0x1b   :  { %249 = vmatmul.mubr.msk.bf16.vlgmr.msra.gmra.mrb[0].mxu0 %vm67_vm1, %v263_v3  ;;  %v141_v11 = vld [vmem:[#allocation2] sm:$0xff]  ;;  %v142_v14 = vld [vmem:[#allocation2 + $0x8] sm:$0xff] }
  0x1c   :  { %v171_v39 = vld [vmem:[#allocation3] sm:$0xff]  ;;  %v172_v44 = vld [vmem:[#allocation3 + $0x8] sm:$0xff] }
  0x1d   :  { %v183_v40 = vld [vmem:[#allocation4] sm:$0xff]  ;;  %v184_v54 = vld [vmem:[#allocation4 + $0x8] sm:$0xff] }
  0x1e   :  { %v128_v52 = vld [vmem:[#allocation5] sm:$0xff]  ;;  %v129_v61 = vld [vmem:[#allocation5 + $0x8] sm:$0xff] }
  0xee   :  { %v105_v6 = vpop.f32.mrb[0].mxu0 }
  0xef   :  { %143 = vmax.xlane.f32.xlu0 %v105_v6  ;;  %v250_v7 = vpop.f32.mrb[1].mxu0 }
  0xf0   :  { %v108_v8 = vpop.f32.mrb[2].mxu0 }
  0xf1   :  { %v251_v9 = vpop.f32.mrb[3].mxu0 }
  0xf3   :  { %145 = vmax.xlane.f32.xlu0 %v108_v8 }
 0x109   :  { %121 = vperm.xlu0 %260, %v114_v10  }
 0x17c   :  { %v144_v12 = vpop.xlane.xlu0 %143 }
 0x17d   :  { %v147_v13 = vmax.f32 %v141_v11, %v144_v12 }
 0x17f   :  { %v149_v15 = vsub.f32 %v141_v11, %v147_v13  ;;  %197 = vst.msk [vmem:[#allocation2] sm:$0xff] %vm35_vm2, %v147_v13  ;;  %157 = vperm.xlu1 %259, %v147_v13  }
 0x180   :  { %v146_v16 = vpop.xlane.xlu0 %145 }
 0x181   :  { %v148_v17 = vmax.f32 %v142_v14, %v146_v16  ;;  %v151_v36 = vmul.f32 1.442695, %v149_v15 }
 0x183   :  { %v150_v18 = vsub.f32 %v142_v14, %v148_v17  ;;  %198 = vst.msk [vmem:[#allocation2 + $0x8] sm:$0xff] %vm35_vm2, %v148_v17  ;;  %162 = vperm.xlu1 %259, %v148_v17  }
 0x185   :  { %v153_v37 = vmul.f32 1.442695, %v150_v18 }
 0x186   :  { %v204_v3 = vld [vmem:[#allocation2] sm:$0xff] }
 0x187   :  { %124 = vperm.xlu1 %259, %v115_v19  }
 0x188   :  { %v122_v30 = vpop.permute.xlu0 %121 }
 0x189   :  { %vm126_vm3 = vcmp.eq.s32.totalorder %v113_v28, %v122_v30 }
 0x18a   :  { %v130_v32 = vsel %vm126_vm3, %v105_v6, 0.0  ;;  %v205_v13 = vld [vmem:[#allocation2 + $0x8] sm:$0xff] }
 0x1fe   :  { %v158_v20 = vpop.permute.xlu1 %157 }
 0x1ff   :  { %v165_v21 = vsub.f32 %v105_v6, %v158_v20 }
 0x201   :  { %v167_v22 = vmul.f32 1.442695, %v165_v21 }
 0x202   :  { %v163_v23 = vpop.permute.xlu1 %162 }
 0x203   :  { %264 = vpow2.f32 %v167_v22  ;;  %v166_v24 = vsub.f32 %v108_v8, %v163_v23 }
 0x205   :  { %v169_v25 = vmul.f32 1.442695, %v166_v24 }
 0x206   :  { %v125_v33 = vpop.permute.xlu1 %124 }
 0x207   :  { %266 = vpow2.f32 %v169_v25  ;;  %vm127_vm4 = vcmp.eq.s32.totalorder %v113_v28, %v125_v33 }
 0x208   :  { %v131_v35 = vsel %vm127_vm4, %v108_v8, 0.0  ;;  %268 = vpow2.f32 %v151_v36 }
 0x209   :  { %270 = vpow2.f32 %v153_v37 }
 0x20d   :  { %v265_v27 = vpop.eup %264 }
 0x20e   :  { %175 = vadd.xlane.f32.xlu1 %v265_v27  ;;  %v187_v29 = vmul.f32 %v265_v27, %v105_v6 }
 0x210   :  { %189 = vadd.xlane.f32.xlu0 %v187_v29 }
 0x211   :  { %v267_v31 = vpop.eup %266 }
 0x212   :  { %177 = vadd.xlane.f32.xlu1 %v267_v31  ;;  %v188_v34 = vmul.f32 %v267_v31, %v108_v8  ;;  %v269_v38 = vpop.eup %268 }
 0x213   :  { %v173_v41 = vmul.f32 %v269_v38, %v171_v39  ;;  %v271_v42 = vpop.eup %270  ;;  %v185_v46 = vmul.f32 %v269_v38, %v183_v40 }
 0x214   :  { %v174_v49 = vmul.f32 %v271_v42, %v172_v44  ;;  %v186_v57 = vmul.f32 %v271_v42, %v184_v54 }
 0x216   :  { %132 = vadd.xlane.f32.xlu1 %v130_v32 }
 0x21a   :  { %191 = vadd.xlane.f32.xlu1 %v188_v34 }
 0x21e   :  { %134 = vadd.xlane.f32.xlu1 %v131_v35 }
 0x29b   :  { %v176_v43 = vpop.xlane.xlu1 %175 }
 0x29c   :  { %v179_v45 = vadd.f32 %v176_v43, %v173_v41 }
 0x29d   :  { %v190_v47 = vpop.xlane.xlu0 %189 }
 0x29e   :  { %181 = vst.msk [vmem:[#allocation3] sm:$0xff] %vm35_vm2, %v179_v45  ;;  %v193_v48 = vadd.f32 %v190_v47, %v185_v46 }
 0x29f   :  { %v178_v50 = vpop.xlane.xlu1 %177 }
 0x2a0   :  { %195 = vst.msk [vmem:[#allocation4] sm:$0xff] %vm35_vm2, %v193_v48  ;;  %v180_v51 = vadd.f32 %v178_v50, %v174_v49 }
 0x2a2   :  { %182 = vst.msk [vmem:[#allocation3 + $0x8] sm:$0xff] %vm35_vm2, %v180_v51 }
 0x2a3   :  { %v133_v53 = vpop.xlane.xlu1 %132 }
 0x2a4   :  { %v136_v55 = vadd.f32 %v133_v53, %v128_v52 }
 0x2a5   :  { %v202_v56 = vld [vmem:[#allocation3] sm:$0xff] }
 0x2a6   :  { %272 = vlog2.f32 %v202_v56  ;;  %139 = vst.msk [vmem:[#allocation5] sm:$0xff] %vm35_vm2, %v136_v55 }
 0x2a7   :  { %274 = vrcp.f32 %v202_v56  ;;  %v192_v58 = vpop.xlane.xlu1 %191  ;;  %v218_v4 = vld [vmem:[#allocation4] sm:$0xff] }
 0x2a8   :  { %v194_v59 = vadd.f32 %v192_v58, %v186_v57 }
 0x2a9   :  { %v203_v60 = vld [vmem:[#allocation3 + $0x8] sm:$0xff] }
 0x2aa   :  { %276 = vlog2.f32 %v203_v60  ;;  %196 = vst.msk [vmem:[#allocation4 + $0x8] sm:$0xff] %vm35_vm2, %v194_v59 }
 0x2ab   :  { %278 = vrcp.f32 %v203_v60  ;;  %v135_v62 = vpop.xlane.xlu1 %134 }
 0x2ac   :  { %v137_v63 = vadd.f32 %v135_v62, %v129_v61 }
 0x2ad   :  { %v212_v8 = vld [vmem:[#allocation5] sm:$0xff] }
 0x2ae   :  { %140 = vst.msk [vmem:[#allocation5 + $0x8] sm:$0xff] %vm35_vm2, %v137_v63 }
 0x2b0   :  { %v273_v0 = vpop.eup %272 }
 0x2b1   :  { %v275_v1 = vpop.eup %274  ;;  %v207_v2 = vmul.f32 0.6931472, %v273_v0  ;;  %v219_v14 = vld [vmem:[#allocation4 + $0x8] sm:$0xff] }
 0x2b2   :  { %v221_v5 = vmul.f32 %v275_v1, %v218_v4 }
 0x2b3   :  { %v210_v6 = vadd.f32 %v207_v2, %v204_v3 }
 0x2b4   :  { %v277_v7 = vpop.eup %276 }
 0x2b5   :  { %v279_v9 = vpop.eup %278  ;;  %v214_v10 = vsub.f32 %v212_v8, %v210_v6  ;;  %v224_v11 = vsub.f32 %v210_v6, %v221_v5  ;;  %v209_v12 = vmul.f32 0.6931472, %v277_v7  ;;  %v213_v17 = vld [vmem:[#allocation5 + $0x8] sm:$0xff] }
 0x2b6   :  { %v223_v15 = vmul.f32 %v279_v9, %v219_v14 }
 0x2b7   :  { %216 = vst.msk [vmem:[%s395_s3] sm:$0xff] %vm35_vm2, %v214_v10  ;;  %226 = vst.msk [vmem:[%s396_s4] sm:$0xff] %vm35_vm2, %v224_v11  ;;  %v211_v16 = vadd.f32 %v209_v12, %v205_v13 }
 0x2b9   :  { %v225_v18 = vsub.f32 %v211_v16, %v223_v15  ;;  %v215_v19 = vsub.f32 %v213_v17, %v211_v16 }
 0x2bb   :  { %227 = vst.msk [vmem:[%s396_s4 + $0x8] sm:$0xff] %vm35_vm2, %v225_v18  ;;  %217 = vst.msk [vmem:[%s395_s3 + $0x8] sm:$0xff] %vm35_vm2, %v215_v19 }
 0x2bc   :  { %236 = vsyncpa [#allocation7], 1 }

</bundles_post_ra>
